<compile_context>
chip_gen: v6e
topology: v6e:2x2x1
jax: 0.10.0
libtpu: 0.0.40
codegen_flags: <defaults>
</compile_context>

<pallas_src>
import functools
import math

import jax
import jax.numpy as jnp
from jax.experimental import pallas as pl
from jax.experimental.pallas import tpu as pltpu


def _round_up(x, m):
    return (x + m - 1) // m * m


def _sublane(dtype):
    # Minimum second-to-last tile dim: 16 for bf16 (packed sublanes), 8 for f32.
    return 16 if jnp.dtype(dtype) == jnp.dtype(jnp.bfloat16) else 8


def _kn_plan(in_channels, out_channels):
    """Tile sizes / padded extents along K (=in) and N (=out). Batch-independent."""
    tn = min(512, _round_up(out_channels, 128))    # lane-dense (unmasked vst) output tiles
    tk = min(2048, _round_up(in_channels, 128))    # 128-multiple covers bf16 sublane on w tile
    kp = _round_up(in_channels, tk)
    np_ = _round_up(out_channels, tn)
    return tk, tn, kp, np_


def _m_plan(batch, compute_dtype):
    """Pick tm (and padded Bp) minimizing padding waste; weight is re-streamed Bp/tm times."""
    sub = _sublane(compute_dtype)
    if batch <= 512:
        tm = _round_up(batch, sub)
        return tm, tm
    best_tm, best_pad = 512, _round_up(batch, 512) - batch
    for tm in range(512, 256 - 1, -sub):
        pad = _round_up(batch, tm) - batch
        if pad < best_pad:
            best_tm, best_pad = tm, pad
    return best_tm, _round_up(batch, best_tm)


def prepare_params(weight, bias, compute_dtype=jnp.bfloat16):
    """One-time parameter prep (do at setup time, NOT per forward call):
    weight (out,in) -> (K,N) layout, tile-padded, cast to the MXU compute dtype;
    bias -> (1, Np) f32."""
    out_channels, in_channels = weight.shape
    _, _, kp, np_ = _kn_plan(in_channels, out_channels)
    w_t = weight.T  # (in, out) -> canonical (K, N) for the MXU
    if w_t.shape != (kp, np_):
        w_t = jnp.pad(w_t, ((0, kp - in_channels), (0, np_ - out_channels)))
    w_prepared = w_t.astype(compute_dtype)
    b = bias.astype(jnp.float32)
    if np_ != out_channels:
        b = jnp.pad(b, (0, np_ - out_channels))
    b_prepared = b.reshape(1, np_)
    return w_prepared, b_prepared


def _kernel_f32_out(x_ref, w_ref, b_ref, o_ref, *, c):
    """f32 output: accumulate directly into the k-resident output block (no scratch)."""
    k = pl.program_id(2)

    @pl.when(k == 0)
    def _():
        o_ref[...] = jnp.zeros_like(o_ref)

    o_ref[...] += jnp.dot(x_ref[...], w_ref[...], preferred_element_type=jnp.float32)

    @pl.when(k == pl.num_programs(2) - 1)
    def _():
        # Fold the equalized-lr scale once per output tile, then add bias.
        o_ref[...] = o_ref[...] * c + b_ref[...]


def _kernel_acc(x_ref, w_ref, b_ref, o_ref, acc_ref, *, c):
    """Low-precision output: f32 VMEM accumulator, single finalize cast."""
    k = pl.program_id(2)

    @pl.when(k == 0)
    def _():
        acc_ref[...] = jnp.zeros_like(acc_ref)

    acc_ref[...] += jnp.dot(x_ref[...], w_ref[...], preferred_element_type=jnp.float32)

    @pl.when(k == pl.num_programs(2) - 1)
    def _():
        o_ref[...] = (acc_ref[...] * c + b_ref[...]).astype(o_ref.dtype)


def equalized_linear(x, w_prepared, b_prepared, *, in_channels, out_channels,
                     compute_dtype=jnp.bfloat16, out_dtype=None):
    """x: (..., in_channels); w_prepared/b_prepared from prepare_params()."""
    lead = x.shape[:-1]
    assert x.shape[-1] == in_channels
    x2 = x.reshape(-1, in_channels)
    batch = x2.shape[0]
    out_dtype = jnp.dtype(x.dtype if out_dtype is None else out_dtype)

    c = 1.0 / math.sqrt(in_channels)  # equalized-lr scale uses the TRUE in_channels

    tk, tn, kp, np_ = _kn_plan(in_channels, out_channels)
    assert w_prepared.shape == (kp, np_), "weight must come from prepare_params()"
    assert b_prepared.shape == (1, np_), "bias must come from prepare_params()"
    tm, bp = _m_plan(batch, compute_dtype)

    # v7x has 2 TensorCores: guarantee >= 2 tiles on the parallel axes when alignment allows.
    sub = _sublane(compute_dtype)
    if (bp // tm) * (np_ // tn) == 1:
        if tn >= 256 and tn % 256 == 0:
            tn //= 2
        elif tm >= 2 * sub and (tm // 2) % sub == 0:
            tm //= 2

    # Activations: cast to the MXU compute dtype; pad only if actually needed.
    x_c = x2 if x2.dtype == jnp.dtype(compute_dtype) else x2.astype(compute_dtype)
    if x_c.shape != (bp, kp):
        x_c = jnp.pad(x_c, ((0, bp - batch), (0, kp - in_channels)))

    grid = (bp // tm, np_ // tn, kp // tk)
    if out_dtype == jnp.dtype(jnp.float32):
        kernel = functools.partial(_kernel_f32_out, c=c)
        scratch_shapes = []
    else:
        kernel = functools.partial(_kernel_acc, c=c)
        scratch_shapes = [pltpu.VMEM((tm, tn), jnp.float32)]

    out = pl.pallas_call(
        kernel,
        out_shape=jax.ShapeDtypeStruct((bp, np_), out_dtype),
        grid_spec=pltpu.PrefetchScalarGridSpec(
            num_scalar_prefetch=0,
            grid=grid,
            in_specs=[
                pl.BlockSpec((tm, tk), lambda i, j, k: (i, k)),   # activations stream
                pl.BlockSpec((tk, tn), lambda i, j, k: (k, j)),   # prepared (K,N) weight
                pl.BlockSpec((1, tn), lambda i, j, k: (0, j)),    # bias
            ],
            out_specs=pl.BlockSpec((tm, tn), lambda i, j, k: (i, j)),
            scratch_shapes=scratch_shapes,
        ),
        compiler_params=pltpu.CompilerParams(
            # batch/out tiles independent -> shard across TCs; K is the reduction -> last.
            dimension_semantics=("parallel", "parallel", "arbitrary"),
            vmem_limit_bytes=48 * 1024 * 1024,
        ),
    )(x_c, w_prepared, b_prepared)

    y = out
    if y.shape != (batch, out_channels):
        y = y[:batch, :out_channels]
    return y.reshape(*lead, out_channels)


if __name__ == "__main__":
    key = jax.random.PRNGKey(0)
    kx, kw = jax.random.split(key)

    batch, in_channels, out_channels = 8, 32, 64
    bias_init = 0.1  # exercise the bias-add path (module default is 0.0)

    x = jax.random.normal(kx, (batch, in_channels), dtype=jnp.float32)
    weight = jax.random.normal(kw, (out_channels, in_channels), dtype=jnp.float32)
    bias = jnp.ones((out_channels,), dtype=jnp.float32) * bias_init

    # One-time parameter preparation (transpose/pad/cast hoisted out of the hot path).
    w_prepared, b_prepared = prepare_params(weight, bias, compute_dtype=jnp.bfloat16)

    y = equalized_linear(
        x, w_prepared, b_prepared,
        in_channels=in_channels, out_channels=out_channels,
        compute_dtype=jnp.bfloat16,
    )
    jax.block_until_ready(y)
    assert y.shape == (batch, out_channels)
    assert y.dtype == x.dtype

    c = 1.0 / math.sqrt(in_channels)

    # Tight check against a reference using the same bf16-rounded operands (f32 accumulate).
    x_b = x.astype(jnp.bfloat16).astype(jnp.float32)
    w_b = weight.T.astype(jnp.bfloat16).astype(jnp.float32)
    y_ref_bf16 = (x_b @ w_b) * c + bias
    assert jnp.allclose(y, y_ref_bf16, atol=1e-3, rtol=1e-3)

    # Loose sanity check against the pure-f32 module math (only bf16 operand rounding differs).
    y_ref_f32 = x @ (weight * c).T + bias
    assert jnp.allclose(y, y_ref_f32, atol=1e-1, rtol=1e-1)

    print("KERNEL_OK")
</pallas_src>

<mosaic_0001>
module attributes {stable_mosaic.version = 11 : i64} {
  func.func @_kernel_f32_out(%arg0: i32, %arg1: i32, %arg2: i32, %arg3: memref<16x128xbf16, #tpu.memory_space<vmem>>, %arg4: memref<128x128xbf16, #tpu.memory_space<vmem>>, %arg5: memref<1x128xf32, #tpu.memory_space<vmem>>, %arg6: memref<16x128xf32, #tpu.memory_space<vmem>>) attributes {dimension_semantics = [#tpu.dimension_semantics<parallel>, #tpu.dimension_semantics<parallel>, #tpu.dimension_semantics<arbitrary>], iteration_bounds = array<i64: 1, 1, 1>, scalar_prefetch = 0 : i64, scratch_operands = 0 : i64, tpu.core_type = #tpu.core_type<tc>, window_params = [{transform_indices = @transform_0, window_bounds = array<i64: 16, 128>}, {transform_indices = @transform_1, window_bounds = array<i64: 128, 128>}, {transform_indices = @transform_2, window_bounds = array<i64: 1, 128>}, {transform_indices = @transform_3, window_bounds = array<i64: 16, 128>}]} {
    %c0_i32 = arith.constant 0 : i32
    %0 = arith.cmpi eq, %arg2, %c0_i32 : i32
    %1 = arith.extui %0 : i1 to i32
    %c0_i32_0 = arith.constant 0 : i32
    %2 = arith.cmpi ne, %1, %c0_i32_0 : i32
    scf.if %2 {
      %cst_10 = arith.constant 0.000000e+00 : f32
      %12 = vector.broadcast %cst_10 : f32 to vector<16x128xf32>
      %c0_11 = arith.constant 0 : index
      %c0_12 = arith.constant 0 : index
      %13 = vector.load %arg6[%c0_11, %c0_12] : memref<16x128xf32, #tpu.memory_space<vmem>>, vector<16x128xf32>
      tpu.vector_store %arg6[%c0_11, %c0_12], %12 {strides = array<i32>} : memref<16x128xf32, #tpu.memory_space<vmem>>, vector<16x128xf32>,
    } else {
    }
    %c0 = arith.constant 0 : index
    %c0_1 = arith.constant 0 : index
    %3 = vector.load %arg6[%c0, %c0_1] : memref<16x128xf32, #tpu.memory_space<vmem>>, vector<16x128xf32>
    %c0_2 = arith.constant 0 : index
    %c0_3 = arith.constant 0 : index
    %4 = vector.load %arg3[%c0_2, %c0_3] : memref<16x128xbf16, #tpu.memory_space<vmem>>, vector<16x128xbf16>
    %c0_4 = arith.constant 0 : index
    %c0_5 = arith.constant 0 : index
    %5 = vector.load %arg4[%c0_4, %c0_5] : memref<128x128xbf16, #tpu.memory_space<vmem>>, vector<128x128xbf16>
    %cst = arith.constant dense<0.000000e+00> : vector<16x128xf32>
    %6 = tpu.matmul %4, %5, %cst {dimension_numbers = #tpu.dot_dimension_numbers<[1], [0], [0], [1], [0, 0, 1, 1], [], []>} : vector<16x128xbf16>, vector<128x128xbf16>, vector<16x128xf32> -> vector<16x128xf32>
    %7 = arith.addf %3, %6 : vector<16x128xf32>
    %c0_6 = arith.constant 0 : index
    %c0_7 = arith.constant 0 : index
    %8 = vector.load %arg6[%c0_6, %c0_7] : memref<16x128xf32, #tpu.memory_space<vmem>>, vector<16x128xf32>
    tpu.vector_store %arg6[%c0_6, %c0_7], %7 {strides = array<i32>} : memref<16x128xf32, #tpu.memory_space<vmem>>, vector<16x128xf32>,
    %c0_i32_8 = arith.constant 0 : i32
    %9 = arith.cmpi eq, %arg2, %c0_i32_8 : i32
    %10 = arith.extui %9 : i1 to i32
    %c0_i32_9 = arith.constant 0 : i32
    %11 = arith.cmpi ne, %10, %c0_i32_9 : i32
    scf.if %11 {
      %c0_10 = arith.constant 0 : index
      %c0_11 = arith.constant 0 : index
      %12 = vector.load %arg6[%c0_10, %c0_11] : memref<16x128xf32, #tpu.memory_space<vmem>>, vector<16x128xf32>
      %cst_12 = arith.constant 0.176776692 : f32
      %13 = vector.broadcast %cst_12 : f32 to vector<16x128xf32>
      %14 = arith.mulf %12, %13 : vector<16x128xf32>
      %c0_13 = arith.constant 0 : index
      %c0_14 = arith.constant 0 : index
      %15 = vector.load %arg5[%c0_13, %c0_14] : memref<1x128xf32, #tpu.memory_space<vmem>>, vector<1x128xf32>
      %16 = vector.broadcast %15 : vector<1x128xf32> to vector<16x128xf32>
      %17 = arith.addf %14, %16 : vector<16x128xf32>
      %c0_15 = arith.constant 0 : index
      %c0_16 = arith.constant 0 : index
      %18 = vector.load %arg6[%c0_15, %c0_16] : memref<16x128xf32, #tpu.memory_space<vmem>>, vector<16x128xf32>
      tpu.vector_store %arg6[%c0_15, %c0_16], %17 {strides = array<i32>} : memref<16x128xf32, #tpu.memory_space<vmem>>, vector<16x128xf32>,
    } else {
    }
    return
  }
  func.func @transform_0(%arg0: i32, %arg1: i32, %arg2: i32) -> (i32, i32) {
    %c0_i32 = arith.constant 0 : i32
    return %arg0, %arg2 : i32, i32
  }
  func.func @transform_1(%arg0: i32, %arg1: i32, %arg2: i32) -> (i32, i32) {
    %c0_i32 = arith.constant 0 : i32
    return %arg2, %arg1 : i32, i32
  }
  func.func @transform_2(%arg0: i32, %arg1: i32, %arg2: i32) -> (i32, i32) {
    %c0_i32 = arith.constant 0 : i32
    %c0_i32_0 = arith.constant 0 : i32
    return %c0_i32, %arg1 : i32, i32
  }
  func.func @transform_3(%arg0: i32, %arg1: i32, %arg2: i32) -> (i32, i32) {
    %c0_i32 = arith.constant 0 : i32
    return %arg0, %arg1 : i32, i32
  }
}

</mosaic_0001>

<bundles_post_ra>
// kernel: tpu_custom_call.1
= control target key start
LH: loop header
LB: loop body
LE: loop exit
PB: predicated region body
PF: predicated region fallthrough
CT: control target
= control target key end

     0   :  { %8 = vsyncpa [#allocation3], 0  ;;  %s369_s0 = inlined_call_operand.hbm [shape: bf16[16,128], index: 0, kind: input, shape index: {}]   ;;  %s370_s1 = inlined_call_operand.hbm [shape: bf16[128,128], index: 1, kind: input, shape index: {}]   ;;  %s371_s2 = inlined_call_operand.vmem [shape: f32[1,128], index: 2, kind: input, shape index: {}]   ;;  %s372_s3 = inlined_call_operand.hbm [shape: f32[16,128], index: 3, kind: output, shape index: {}]  }
   0x1   :  { %9 = vsyncpa [#allocation6], 0 }
   0x2   :  { %10 = vsyncpa [#allocation4], 0  ;;  %s328_s12 = smov [#allocation2]  }
   0x3   :  { %s16_s13 = sshll.u32 %s328_s12, 4  ;;  %s17_s13 = int_to_ptr.vmem [resolvable:$true] %s16_s13 }
   0x4   :  { %s270_s14 = scalar_lea.vmem %s17_s13, 128  ;;  %p275_p1 = scmp.lt.s32.totalorder %s17_s13, %s17_s13 }
   0x5   :  { %p271_p0 = scmp.ne.s32.totalorder %s17_s13, %s270_s14  ;;  %p276_p2 = scmp.lt.s32.totalorder %s270_s14, %s270_s14 }
   0x7   :  { %p277_p3 = por %p276_p2, %p275_p1 }
   0x9   :  { %p278_p4 = pnand %p277_p3, %p271_p0 }
   0xb   :  { %281 = shalt.err (!%p278_p4)
}
   0xc   :  { %s329_s15 = smov 64   ;;  %s330_s16 = smov 4  }
   0xd   :  { %22 = dma.hbm_to_vmem [thread:$0]  %s369_s0, 128, %s17_s13, [#allocation3], %s329_s15, %s329_s15, %s330_s16  }
   0xe   :  { %s331_s19 = smov [#allocation5]  }
   0xf   :  { %s28_s20 = sshll.u32 %s331_s19, 4  ;;  %s29_s20 = int_to_ptr.vmem [resolvable:$true] %s28_s20 }
  0x10   :  { %s290_s21 = scalar_lea.vmem %s29_s20, 1024  ;;  %p295_p6 = scmp.lt.s32.totalorder %s29_s20, %s29_s20 }
  0x11   :  { %p291_p5 = scmp.ne.s32.totalorder %s29_s20, %s290_s21  ;;  %p296_p7 = scmp.lt.s32.totalorder %s290_s21, %s290_s21 }
  0x13   :  { %p297_p8 = por %p296_p7, %p295_p6 }
  0x15   :  { %p298_p9 = pnand %p297_p8, %p291_p5 }
  0x17   :  { %301 = shalt.err (!%p298_p9)
}
  0x18   :  { %34 = dma.hbm_to_vmem [thread:$0]  %s370_s1, 1024, %s29_s20, [#allocation6], %s329_s15, %s329_s15, %s330_s16  }
  0x19   :  { %322 = dma.done.wait [#allocation3], 128  }
  0x1a   :  { %323 = vsyncadd [#allocation3], 4294967168 }
  0x1b   :  { %324 = dma.done.wait [#allocation6], 1024  }
  0x1c   :  { %325 = vsyncadd [#allocation6], 4294966272  ;;  %v332_v0 = vmov 0.0   ;;  %vm333_vm0 = vmmov 0   ;;  %v253_v1 = vld [vmem:[#allocation5 + $0x38] sm:$0xff]   ;;  %v254_v2 = vld [vmem:[#allocation5 + $0x30] sm:$0xff]  }
  0x1d   :  { %224 = vmatprep.subr.bf16.mxu0 %v332_v0  ;;  %240 = vmatprep.mubr.msk.bf16.mxu0 %vm333_vm0, %v332_v0  ;;  %v255_v3 = vld [vmem:[#allocation5 + $0x28] sm:$0xff]   ;;  %v256_v4 = vld [vmem:[#allocation5 + $0x20] sm:$0xff]   ;;  %v257_v5 = vld [vmem:[#allocation5 + $0x18] sm:$0xff]   ;;  %s334_s24 = smov [#allocation7]  }
  0x1e   :  { %225 = vmatpush3.bf16.msra.mxu0 %v253_v1  ;;  %v258_v6 = vld [vmem:[#allocation5 + $0x10] sm:$0xff]   ;;  %v259_v7 = vld [vmem:[#allocation5 + $0x8] sm:$0xff]   ;;  %v260_v8 = vld [vmem:[#allocation5] sm:$0xff]   ;;  %s192_s25 = sshll.u32 %s334_s24, 4  ;;  %s193_s25 = int_to_ptr.vmem [resolvable:$true] %s192_s25 }
  0x1f   :  { %226 = vmatprep.subr.bf16.mxu0 %v332_v0  ;;  %v261_v9 = vld [vmem:[#allocation2] sm:$0xff]   ;;  %s302_s26 = scalar_lea.vmem %s193_s25, 256  ;;  %p307_p11 = scmp.lt.s32.totalorder %s193_s25, %s193_s25 }
  0x20   :  { %v214_v12 = vld [vmem:[%s371_s2] ss:$0 sm:$0xff]  ;;  %p303_p10 = scmp.ne.s32.totalorder %s193_s25, %s302_s26  ;;  %p308_p12 = scmp.lt.s32.totalorder %s302_s26, %s302_s26 }
  0x22   :  { %227 = vmatpush3.bf16.msra.mxu0 %v254_v2  ;;  %p309_p13 = por %p308_p12, %p307_p11 }
  0x23   :  { %228 = vmatprep.subr.bf16.mxu0 %v332_v0 }
  0x24   :  { %p310_p0 = pnand %p309_p13, %p303_p10 }
  0x26   :  { %229 = vmatpush3.bf16.msra.mxu0 %v255_v3 }
  0x27   :  { %230 = vmatprep.subr.bf16.mxu0 %v332_v0 }
  0x2a   :  { %231 = vmatpush3.bf16.msra.mxu0 %v256_v4 }
  0x2b   :  { %232 = vmatprep.subr.bf16.mxu0 %v332_v0 }
  0x2e   :  { %233 = vmatpush3.bf16.msra.mxu0 %v257_v5 }
  0x2f   :  { %234 = vmatprep.subr.bf16.mxu0 %v332_v0 }
  0x32   :  { %235 = vmatpush3.bf16.msra.mxu0 %v258_v6 }
  0x33   :  { %236 = vmatprep.subr.bf16.mxu0 %v332_v0 }
  0x36   :  { %237 = vmatpush3.bf16.msra.mxu0 %v259_v7 }
  0x37   :  { %238 = vmatprep.subr.bf16.mxu0 %v332_v0 }
  0x3a   :  { %239 = vmatpush3.bf16.msra.mxu0 %v260_v8 }
  0x3d   :  { %241 = vmatmul.mubr.bf16.vlgmr.msra.gmra.mxu0 %v261_v9 }
  0xfd   :  { %v158_v10 = vpop.f32.mrf.mxu0 }
  0xfe   :  { %v174_v13 = vmul.f32 0.17677669, %v158_v10 }
  0xff   :  { %v242_v11 = vpop.f32.mrf.mxu0 }
 0x100   :  { %v183_v15 = vadd.f32 %v214_v12, %v174_v13 }
 0x101   :  { %v161_v14 = vpop.f32.mrf.mxu0 }
 0x102   :  { %v175_v17 = vmul.f32 0.17677669, %v161_v14  ;;  %185 = vst [vmem:[#allocation7] sm:$0xff] %v183_v15 }
 0x103   :  { %v243_v16 = vpop.f32.mrf.mxu0 }
 0x104   :  { %v184_v18 = vadd.f32 %v214_v12, %v175_v17 }
 0x106   :  { %186 = vst [vmem:[#allocation7 + $0x8] sm:$0xff] %v184_v18 }
 0x107   :  { %313 = shalt.err (!%p310_p0)
}
 0x108   :  { %s335_s27 = smov 128   ;;  %s336_s2 = smov 8  }
 0x109   :  { %198 = dma.vmem_to_hbm [thread:$0]  %s193_s25, 256, %s372_s3, [#allocation4], %s335_s27, %s335_s27, %s336_s2  }
 0x10a   :  { %326 = dma.done.wait [#allocation4], 256  }
 0x10b   :  { %327 = vsyncadd [#allocation4], 4294967040 }
 0x10c   :  { %202 = vsyncpa [#allocation3], 1 }
 0x10d   :  { %203 = vsyncpa [#allocation6], 1 }
 0x10e   :  { %204 = vsyncpa [#allocation4], 1 }

</bundles_post_ra>
